<compile_context>
chip_gen: v7x
topology: tpu7x:2x2x1
jax: 0.10.0
libtpu: 0.0.40
codegen_flags: <defaults>
</compile_context>

<pallas_src>
import functools

import jax
import jax.numpy as jnp
from jax import lax
from jax.experimental import pallas as pl
from jax.experimental.pallas import tpu as pltpu


def _mlp_kernel(x_ref, w1_ref, b1_ref, w2_ref, b2_ref, o_ref, *, chunk,
                compute_dtype):
    """One batch tile of relu(x @ W1b + b1b) @ W2b + b2b on the 8-row-folded layout.

    x_ref : (tb_rs, 8*n_input)   f32  (8 batch rows folded per lane row)
    w1_ref: (8*n_input, 8*n_hidden)   compute_dtype, block-diag kron(eye(8), W1.T)
    b1_ref: (1, 8*n_hidden)      f32
    w2_ref: (8*n_hidden, 8*n_output)  compute_dtype, block-diag kron(eye(8), W2.T)
    b2_ref: (1, 8*n_output)      f32
    o_ref : (tb_rs, 8*n_output)  f32
    """
    # Resident operands: load once per grid step, outside the chunk loop.
    w1 = w1_ref[...]
    w2 = w2_ref[...]
    b1 = b1_ref[...]
    b2 = b2_ref[...]
    nchunks = o_ref.shape[0] // chunk  # tb_rs is a multiple of chunk by construction

    def body(c, carry):
        r0 = pl.multiple_of(c * chunk, chunk)
        xb = x_ref[pl.ds(r0, chunk), :].astype(compute_dtype)
        # hT-folded = relu(x_fold @ kron(I8, W1.T) + b1_tiled), f32 accumulation.
        h = jnp.dot(xb, w1, preferred_element_type=jnp.float32)
        h = jnp.maximum(h + b1, 0.0).astype(compute_dtype)
        # y_fold = h_fold @ kron(I8, W2.T) + b2_tiled
        y = jnp.dot(h, w2, preferred_element_type=jnp.float32) + b2
        o_ref[pl.ds(r0, chunk), :] = y.astype(o_ref.dtype)
        return carry

    lax.fori_loop(0, nchunks, body, 0)


def train_data_net_forward(x, w1, b1, w2, b2, *, block_rows=131072,
                           chunk_rows=4096, compute_dtype=jnp.bfloat16):
    """Forward pass of TrainDataNet: relu(x @ W1.T + b1) @ W2.T + b2.

    x : (B, n_input) float32
    w1: (n_hidden, n_input)   -- torch nn.Linear layout
    b1: (n_hidden,)
    w2: (n_output, n_hidden)  -- torch nn.Linear layout
    b2: (n_output,)
    returns (B, n_output) float32
    """
    B, n_input = x.shape
    n_hidden = w1.shape[0]
    n_output = w2.shape[0]

    G = 8  # batch rows folded per lane row (vreg sublane height)

    xp = x.astype(jnp.float32)
    Bp = B
    if B % G:  # rare; pads with zeros (one extra HBM pass only in this case)
        Bp = pl.cdiv(B, G) * G
        xp = jnp.pad(xp, ((0, Bp - B), (0, 0)))

    B_rs = Bp // G
    LIN, LH, LOUT = G * n_input, G * n_hidden, G * n_output

    # Row-major reshape (bitcast under jit, zero HBM traffic): 8 rows / lane-row.
    x_rs = xp.reshape(B_rs, LIN)

    # Block-diagonal weights keep the folded rows independent (mathematically exact).
    eye = jnp.eye(G, dtype=jnp.float32)
    w1_big = jnp.kron(eye, w1.T.astype(jnp.float32)).astype(compute_dtype)  # (LIN, LH)
    w2_big = jnp.kron(eye, w2.T.astype(jnp.float32)).astype(compute_dtype)  # (LH, LOUT)
    b1_big = jnp.tile(b1.astype(jnp.float32), G).reshape(1, LH)
    b2_big = jnp.tile(b2.astype(jnp.float32), G).reshape(1, LOUT)

    # ---- tile sizing (per perf review) ------------------------------------
    lin_pad = pl.cdiv(LIN, 128) * 128
    lout_pad = pl.cdiv(LOUT, 128) * 128
    per_row_blk = 2 * 4 * (lin_pad + lout_pad)  # double-buffered in+out bytes / rs-row

    chunk_rs = max(8, (min(chunk_rows, block_rows) // G // 8) * 8)
    if B_rs <= chunk_rs:
        tb_rs = B_rs          # tiny batch: one block, one chunk (full-extent block)
        chunk_rs = B_rs
    else:
        # Cap so double-buffered in/out blocks stay within ~24 MiB (fits v5e's
        # 16 MiB default once vmem_limit_bytes is raised, and v6e/v7x easily).
        cap_rs = max(chunk_rs, ((24 << 20) // per_row_blk // chunk_rs) * chunk_rs)
        want_rs = max(chunk_rs, (block_rows // G // chunk_rs) * chunk_rs)
        # Aim for >= 2 grid steps so v7x megacore keeps both TensorCores busy.
        half_rs = pl.cdiv(pl.cdiv(B_rs, 2), chunk_rs) * chunk_rs
        tb_rs = max(chunk_rs, min(cap_rs, want_rs, half_rs))

    grid = (pl.cdiv(B_rs, tb_rs),)

    vmem_limit = int(min(40 << 20, max(16 << 20, tb_rs * per_row_blk + (8 << 20))))

    flops = 2 * B_rs * (LIN * LH + LH * LOUT)  # actual (block-diag inflated) MXU flops
    bytes_accessed = (x_rs.size * 4 + B_rs * LOUT * 4
                      + w1_big.size * w1_big.dtype.itemsize
                      + w2_big.size * w2_big.dtype.itemsize
                      + (b1_big.size + b2_big.size) * 4)

    kernel = functools.partial(_mlp_kernel, chunk=chunk_rs,
                               compute_dtype=compute_dtype)

    y_rs = pl.pallas_call(
        kernel,
        out_shape=jax.ShapeDtypeStruct((B_rs, LOUT), jnp.float32),
        grid=grid,
        in_specs=[
            # Streamed activations: new batch tile every grid step (lane-dense).
            pl.BlockSpec((tb_rs, LIN), lambda i: (i, 0)),
            # Resident weights / biases: constant block index -> DMA'd once.
            pl.BlockSpec((LIN, LH), lambda i: (0, 0)),
            pl.BlockSpec((1, LH), lambda i: (0, 0)),
            pl.BlockSpec((LH, LOUT), lambda i: (0, 0)),
            pl.BlockSpec((1, LOUT), lambda i: (0, 0)),
        ],
        out_specs=pl.BlockSpec((tb_rs, LOUT), lambda i: (i, 0)),
        compiler_params=pltpu.CompilerParams(
            dimension_semantics=("parallel",),
            vmem_limit_bytes=vmem_limit),
        cost_estimate=pl.CostEstimate(
            flops=flops, transcendentals=0, bytes_accessed=bytes_accessed),
    )(x_rs, w1_big, b1_big, w2_big, b2_big)

    # Row-major reshape back to the natural (B, n_output) layout (free bitcast).
    y = y_rs.reshape(Bp, n_output)
    return y[:B] if Bp != B else y


def init_params(key, n_input, n_hidden, n_output, std=1.0):
    """Parameter init mirroring TrainDataNet.reset_weights(std=1), torch layout."""
    k1, k2, k3, k4 = jax.random.split(key, 4)
    w1 = jax.random.normal(k1, (n_hidden, n_input), jnp.float32) * std
    b1 = jax.random.normal(k2, (n_hidden,), jnp.float32) * std
    w2 = jax.random.normal(k3, (n_output, n_hidden), jnp.float32) * std
    b2 = jax.random.normal(k4, (n_output,), jnp.float32) * std
    return w1, b1, w2, b2


if __name__ == "__main__":
    # Small shapes consistent with the module; block_rows/chunk_rows are shrunk
    # so the demo still exercises the batch grid (4 steps) and the inner chunk
    # loop (2 chunks per step).
    B, n_input, n_hidden, n_output = 2048, 16, 32, 4

    key = jax.random.PRNGKey(0)
    kx, kp = jax.random.split(key)
    x = jax.random.normal(kx, (B, n_input), jnp.float32)
    w1, b1, w2, b2 = init_params(kp, n_input, n_hidden, n_output, std=1.0)

    fwd = jax.jit(functools.partial(train_data_net_forward,
                                    block_rows=512, chunk_rows=256))
    y = jax.block_until_ready(fwd(x, w1, b1, w2, b2))
    assert y.shape == (B, n_output)

    # Reference emulating the kernel's bf16-operand / f32-accumulate path.
    # (Pass compute_dtype=jnp.float32 to the kernel for exact f32 parity.)
    xe = x.astype(jnp.bfloat16).astype(jnp.float32)
    w1e = w1.astype(jnp.bfloat16).astype(jnp.float32)
    w2e = w2.astype(jnp.bfloat16).astype(jnp.float32)
    h_ref = jnp.maximum(xe @ w1e.T + b1[None, :], 0.0)
    h_ref = h_ref.astype(jnp.bfloat16).astype(jnp.float32)
    ref = h_ref @ w2e.T + b2[None, :]
    assert jnp.allclose(y, ref, atol=1e-2, rtol=1e-2), \
        float(jnp.max(jnp.abs(y - ref)))

    print("KERNEL_OK")
</pallas_src>

<mosaic_0001>
module attributes {stable_mosaic.version = 11 : i64} {
  func.func @_mlp_kernel(%arg0: i32, %arg1: memref<64x128xf32, #tpu.memory_space<vmem>>, %arg2: memref<128x256xbf16, #tpu.memory_space<vmem>>, %arg3: memref<1x256xf32, #tpu.memory_space<vmem>>, %arg4: memref<256x32xbf16, #tpu.memory_space<vmem>>, %arg5: memref<1x32xf32, #tpu.memory_space<vmem>>, %arg6: memref<64x32xf32, #tpu.memory_space<vmem>>) attributes {dimension_semantics = [#tpu.dimension_semantics<parallel>], iteration_bounds = array<i64: 4>, scalar_prefetch = 0 : i64, scratch_operands = 0 : i64, tpu.core_type = #tpu.core_type<tc>, window_params = [{transform_indices = @transform_0, window_bounds = array<i64: 64, 128>}, {pipeline_mode = #tpu.pipeline_mode<synchronous>, transform_indices = @transform_1, window_bounds = array<i64: 128, 256>}, {pipeline_mode = #tpu.pipeline_mode<synchronous>, transform_indices = @transform_2, window_bounds = array<i64: 1, 256>}, {pipeline_mode = #tpu.pipeline_mode<synchronous>, transform_indices = @transform_3, window_bounds = array<i64: 256, 32>}, {pipeline_mode = #tpu.pipeline_mode<synchronous>, transform_indices = @transform_4, window_bounds = array<i64: 1, 32>}, {transform_indices = @transform_5, window_bounds = array<i64: 64, 32>}]} {
    %c0 = arith.constant 0 : index
    %c0_0 = arith.constant 0 : index
    %0 = vector.load %arg2[%c0, %c0_0] : memref<128x256xbf16, #tpu.memory_space<vmem>>, vector<128x256xbf16>
    %c0_1 = arith.constant 0 : index
    %c0_2 = arith.constant 0 : index
    %1 = vector.load %arg4[%c0_1, %c0_2] : memref<256x32xbf16, #tpu.memory_space<vmem>>, vector<256x32xbf16>
    %c0_3 = arith.constant 0 : index
    %c0_4 = arith.constant 0 : index
    %2 = vector.load %arg3[%c0_3, %c0_4] : memref<1x256xf32, #tpu.memory_space<vmem>>, vector<1x256xf32>
    %c0_5 = arith.constant 0 : index
    %c0_6 = arith.constant 0 : index
    %3 = vector.load %arg5[%c0_5, %c0_6] : memref<1x32xf32, #tpu.memory_space<vmem>>, vector<1x32xf32>
    %c0_i32 = arith.constant 0 : i32
    %c2_i32 = arith.constant 2 : i32
    %4 = arith.addi %c0_i32, %c2_i32 : i32
    %c1_i32 = arith.constant 1 : i32
    scf.for %arg7 = %c0_i32 to %4 step %c1_i32  : i32 {
      %c32_i32 = arith.constant 32 : i32
      %5 = arith.muli %arg7, %c32_i32 : i32
      %6 = tpu.assume_multiple %5, 32 : i32
      %7 = arith.index_cast %6 : i32 to index
      %c0_8 = arith.constant 0 : index
      %8 = vector.load %arg1[%7, %c0_8] : memref<64x128xf32, #tpu.memory_space<vmem>>, vector<32x128xf32>
      %9 = arith.truncf %8 : vector<32x128xf32> to vector<32x128xbf16>
      %cst = arith.constant dense<0.000000e+00> : vector<32x256xf32>
      %10 = tpu.matmul %9, %0, %cst {dimension_numbers = #tpu.dot_dimension_numbers<[1], [0], [0], [1], [0, 0, 1, 1], [], []>} : vector<32x128xbf16>, vector<128x256xbf16>, vector<32x256xf32> -> vector<32x256xf32>
      %11 = vector.broadcast %2 : vector<1x256xf32> to vector<32x256xf32>
      %12 = arith.addf %10, %11 : vector<32x256xf32>
      %cst_9 = arith.constant 0.000000e+00 : f32
      %13 = vector.broadcast %cst_9 : f32 to vector<32x256xf32>
      %14 = arith.maximumf %12, %13 : vector<32x256xf32>
      %15 = arith.truncf %14 : vector<32x256xf32> to vector<32x256xbf16>
      %cst_10 = arith.constant dense<0.000000e+00> : vector<32x32xf32>
      %16 = tpu.matmul %15, %1, %cst_10 {dimension_numbers = #tpu.dot_dimension_numbers<[1], [0], [0], [1], [0, 0, 1, 1], [], []>} : vector<32x256xbf16>, vector<256x32xbf16>, vector<32x32xf32> -> vector<32x32xf32>
      %17 = vector.broadcast %3 : vector<1x32xf32> to vector<32x32xf32>
      %18 = arith.addf %16, %17 : vector<32x32xf32>
      %19 = arith.index_cast %6 : i32 to index
      %c0_11 = arith.constant 0 : index
      %20 = vector.load %arg6[%19, %c0_11] : memref<64x32xf32, #tpu.memory_space<vmem>>, vector<32x32xf32>
      tpu.vector_store %arg6[%19, %c0_11], %18 {strides = array<i32>} : memref<64x32xf32, #tpu.memory_space<vmem>>, vector<32x32xf32>,
    }
    %c2_i32_7 = arith.constant 2 : i32
    return
  }
  func.func @transform_0(%arg0: i32) -> (i32, i32) {
    %c0_i32 = arith.constant 0 : i32
    %c0_i32_0 = arith.constant 0 : i32
    return %arg0, %c0_i32 : i32, i32
  }
  func.func @transform_1(%arg0: i32) -> (i32, i32) {
    %c0_i32 = arith.constant 0 : i32
    %c0_i32_0 = arith.constant 0 : i32
    %c0_i32_1 = arith.constant 0 : i32
    return %c0_i32, %c0_i32_0 : i32, i32
  }
  func.func @transform_2(%arg0: i32) -> (i32, i32) {
    %c0_i32 = arith.constant 0 : i32
    %c0_i32_0 = arith.constant 0 : i32
    %c0_i32_1 = arith.constant 0 : i32
    return %c0_i32, %c0_i32_0 : i32, i32
  }
  func.func @transform_3(%arg0: i32) -> (i32, i32) {
    %c0_i32 = arith.constant 0 : i32
    %c0_i32_0 = arith.constant 0 : i32
    %c0_i32_1 = arith.constant 0 : i32
    return %c0_i32, %c0_i32_0 : i32, i32
  }
  func.func @transform_4(%arg0: i32) -> (i32, i32) {
    %c0_i32 = arith.constant 0 : i32
    %c0_i32_0 = arith.constant 0 : i32
    %c0_i32_1 = arith.constant 0 : i32
    return %c0_i32, %c0_i32_0 : i32, i32
  }
  func.func @transform_5(%arg0: i32) -> (i32, i32) {
    %c0_i32 = arith.constant 0 : i32
    %c0_i32_0 = arith.constant 0 : i32
    return %arg0, %c0_i32 : i32, i32
  }
}

</mosaic_0001>

<bundles_post_ra>
// kernel: tile.13
= control target key start
LH: loop header
LB: loop body
LE: loop exit
PB: predicated region body
PF: predicated region fallthrough
CT: control target
= control target key end

     0   :  { %s22_s0 = inlined_call_operand.vmem [shape: f32[32], index: 0, kind: input, shape index: {}]   ;;  %s23_s1 = inlined_call_operand.vmem [shape: f32[8,32], index: 1, kind: output, shape index: {}]  }
   0x1   :  { %v4_v0 = vld [vmem:[%s22_s0] ss:$0 sm:$0xff] }
   0x2   :  { %5 = vst [vmem:[%s23_s1] sm:$0xff] %v4_v0 }

// kernel: tile.14
= control target key start
LH: loop header
LB: loop body
LE: loop exit
PB: predicated region body
PF: predicated region fallthrough
CT: control target
= control target key end

     0   :  { %s7_s6 = smov 3  ;;  %s14_s9 = smov 3  ;;  %vm4_vm0 = vcmask 261120   ;;  %vm11_vm1 = vcmask 1048320   ;;  %vm18_vm2 = vcmask 785920   ;;  %vm25_vm3 = vcmask 523520   ;;  %s76_s0 = inlined_call_operand.vmem [shape: f32[8,32], index: 0, kind: input, shape index: {}]   ;;  %s77_s1 = inlined_call_operand.vmem [shape: f32[1,256], index: 1, kind: output, shape index: {}]  }
   0x1   :  { %v38_v0 = vld [vmem:[%s76_s0 + $0x3] ss:$4 sm:%s7_s6]   ;;  %s45_s10 = smov 96   ;;  %s21_s11 = smov 3  ;;  %v39_v1 = vld [vmem:[%s76_s0 + $0x2] ss:$4 sm:%s14_s9]  }
   0x2   :  { %9 = vrot.lane.b32.xlu0 %v38_v0, %s45_s10  ;;  %v40_v2 = vld [vmem:[%s76_s0 + $0x1] ss:$4 sm:%s21_s11]   ;;  %s2_s16 = smov 3  ;;  %s46_s17 = smov 32  }
   0x3   :  { %23 = vrot.lane.b32.xlu1 %v40_v2, %s46_s17  ;;  %v3_v3 = vld [vmem:[%s76_s0] ss:$4 sm:%s2_s16]   ;;  %s47_s0 = smov 64  }
   0x4   :  { %5 = vst.msk [vmem:[#allocation0] ss:$8 sm:$0x3] %vm4_vm0, %v3_v3  }
   0x6   :  { %16 = vrot.lane.b32.xlu0 %v39_v1, %s47_s0 }
  0x74   :  { %v10_v4 = vpop.permute.xlu0 %9  }
  0x75   :  { %12 = vst.msk [vmem:[#allocation0] ss:$8 sm:$0x3] %vm11_vm1, %v10_v4   ;;  %v24_v5 = vpop.permute.xlu1 %23  }
  0x78   :  { %v17_v6 = vpop.permute.xlu0 %16  }
  0x79   :  { %19 = vst.msk [vmem:[#allocation0] ss:$8 sm:$0x3] %vm18_vm2, %v17_v6  }
  0x7a   :  { %26 = vst.msk [vmem:[#allocation0] ss:$8 sm:$0x3] %vm25_vm3, %v24_v5  }
  0x81   :  { %v30_v7 = vld [vmem:[#allocation0] sm:$0x1]  ;;  %v34_v8 = vld [vmem:[#allocation0 + $0x8] sm:$0x1] }
  0x82   :  { %32 = vst [vmem:[%s77_s1] sm:$0x1] %v30_v7  ;;  %41 = vst [vmem:[%s77_s1 + $0x1] sm:$0x1] %v34_v8 }

// kernel: tile.18
= control target key start
LH: loop header
LB: loop body
LE: loop exit
PB: predicated region body
PF: predicated region fallthrough
CT: control target
= control target key end

     0   :  { %s22_s0 = inlined_call_operand.vmem [shape: f32[4], index: 0, kind: input, shape index: {}]   ;;  %s23_s1 = inlined_call_operand.vmem [shape: f32[8,4], index: 1, kind: output, shape index: {}]  }
   0x1   :  { %v4_v0 = vld [vmem:[%s22_s0] ss:$0 sm:$0xff] }
   0x2   :  { %5 = vst [vmem:[%s23_s1] sm:$0xff] %v4_v0 }

// kernel: tile.19
= control target key start
LH: loop header
LB: loop body
LE: loop exit
PB: predicated region body
PF: predicated region fallthrough
CT: control target
= control target key end

     0   :  { %s67_s10 = smov 28   ;;  %s68_s11 = smov 20   ;;  %vm3_vm0 = vcmask 31744   ;;  %vm9_vm1 = vcmask 261344   ;;  %vm15_vm2 = vcmask 228544   ;;  %vm21_vm3 = vcmask 195744   ;;  %s111_s0 = inlined_call_operand.vmem [shape: f32[8,4], index: 0, kind: input, shape index: {}]   ;;  %s112_s1 = inlined_call_operand.vmem [shape: f32[1,32], index: 1, kind: output, shape index: {}]  }
   0x1   :  { %v53_v0 = vld [vmem:[%s111_s0 + $0x7] sm:$0x1]   ;;  %v55_v1 = vld [vmem:[%s111_s0 + $0x5] sm:$0x1]   ;;  %v54_v2 = vld [vmem:[%s111_s0 + $0x6] sm:$0x1]  }
   0x2   :  { %7 = vrot.lane.b32.xlu0 %v53_v0, %s67_s10  ;;  %19 = vrot.lane.b32.xlu1 %v55_v1, %s68_s11  ;;  %v56_v3 = vld [vmem:[%s111_s0 + $0x4] sm:$0x1]   ;;  %v2_v4 = vld [vmem:[%s111_s0] sm:$0x1]   ;;  %s69_s18 = smov 24   ;;  %s70_s19 = smov 16  }
   0x3   :  { %4 = vst.msk [vmem:[#allocation0] sm:$0x1] %vm3_vm0, %v2_v4   ;;  %v57_v5 = vld [vmem:[%s111_s0 + $0x3] sm:$0x1]   ;;  %v58_v6 = vld [vmem:[%s111_s0 + $0x2] sm:$0x1]  }
   0x4   :  { %s71_s24 = smov 12   ;;  %s72_s25 = smov 8   ;;  %v59_v7 = vld [vmem:[%s111_s0 + $0x1] sm:$0x1]   ;;  %vm27_vm4 = vcmask 162944   ;;  %vm33_vm5 = vcmask 130144  }
   0x5   :  { %s73_s0 = smov 4   ;;  %vm39_vm6 = vcmask 97344   ;;  %vm45_vm7 = vcmask 64544  }
   0x6   :  { %13 = vrot.lane.b32.xlu0 %v54_v2, %s69_s18  ;;  %25 = vrot.lane.b32.xlu1 %v56_v3, %s70_s19 }
   0xa   :  { %31 = vrot.lane.b32.xlu0 %v57_v5, %s71_s24  ;;  %37 = vrot.lane.b32.xlu1 %v58_v6, %s72_s25 }
   0xe   :  { %43 = vrot.lane.b32.xlu0 %v59_v7, %s73_s0 }
  0x74   :  { %v8_v8 = vpop.permute.xlu0 %7   ;;  %v20_v9 = vpop.permute.xlu1 %19  }
  0x75   :  { %10 = vst.msk [vmem:[#allocation0] sm:$0x1] %vm9_vm1, %v8_v8  }
  0x78   :  { %v14_v10 = vpop.permute.xlu0 %13   ;;  %v26_v11 = vpop.permute.xlu1 %25  }
  0x79   :  { %16 = vst.msk [vmem:[#allocation0] sm:$0x1] %vm15_vm2, %v14_v10  }
  0x7a   :  { %22 = vst.msk [vmem:[#allocation0] sm:$0x1] %vm21_vm3, %v20_v9  }
  0x7b   :  { %28 = vst.msk [vmem:[#allocation0] sm:$0x1] %vm27_vm4, %v26_v11  }
  0x7c   :  { %v32_v12 = vpop.permute.xlu0 %31   ;;  %v38_v13 = vpop.permute.xlu1 %37  }
  0x7d   :  { %34 = vst.msk [vmem:[#allocation0] sm:$0x1] %vm33_vm5, %v32_v12  }
  0x7e   :  { %40 = vst.msk [vmem:[#allocation0] sm:$0x1] %vm39_vm6, %v38_v13  }
  0x80   :  { %v44_v14 = vpop.permute.xlu0 %43  }
  0x81   :  { %46 = vst.msk [vmem:[#allocation0] sm:$0x1] %vm45_vm7, %v44_v14  }
  0x88   :  { %v50_v15 = vld [vmem:[#allocation0] sm:$0x1] }
  0x89   :  { %52 = vst [vmem:[%s112_s1] sm:$0x1] %v50_v15 }

// kernel: train_data_net_forward.1
= control target key start
LH: loop header
LB: loop body
LE: loop exit
PB: predicated region body
PF: predicated region fallthrough
CT: control target
= control target key end

     0   :  { %s808_s18 = smov 0   ;;  %s1168_s0 = inlined_call_operand.vmem [shape: f32[256,128], index: 0, kind: input, shape index: {}]   ;;  %s1169_s1 = inlined_call_operand.vmem [shape: bf16[128,256], index: 1, kind: input, shape index: {}]   ;;  %s1170_s2 = inlined_call_operand.vmem [shape: f32[1,256], index: 2, kind: input, shape index: {}]   ;;  %s1171_s3 = inlined_call_operand.vmem [shape: bf16[256,32], index: 3, kind: input, shape index: {}]   ;;  %s1172_s4 = inlined_call_operand.vmem [shape: f32[1,32], index: 4, kind: input, shape index: {}]   ;;  %s1173_s5 = inlined_call_operand.vmem [shape: f32[256,32], index: 5, kind: output, shape index: {}]  }
   0x1 LB: > { %s671_s19 = sadd.s32 4294967295, %s771_s18   ;;  %p675_p0 = scmp.ge.s32.totalorder %s771_s18, 1  ;;  %s771_s18 = sphi %s808_s18, %s15_s18  }
   0x2   : > { %p188_p1 = scmp.lt.s32.totalorder %s771_s18, 5 }
   0x4   : > { %p189_p2 = pnand %p675_p0, %p188_p1 }
   0x5   : > { %s676_s20 = sshll.u32 (!%p189_p2), %s671_s19, 3  ;;  %v819_v0 = vld [vmem:[%s1169_s1] sm:$0xff] (!%p189_p2)  ;;  %v824_v1 = vld [vmem:[%s1169_s1 + $0x8] sm:$0xff] (!%p189_p2)  ;;  %v829_v2 = vld [vmem:[%s1169_s1 + $0x10] sm:$0xff] (!%p189_p2) }
   0x6   : > { %192 = sbr.rel (%p189_p2) target bundleno = 512 (0x200), region = 40  ;;  %1182 = vst [vmem:[#allocation2_spill] sm:$0xff] (!%p189_p2), %v819_v0  ;;  %1183 = vst [vmem:[#allocation3_spill] sm:$0xff] (!%p189_p2), %v824_v1  ;;  %p217_p3 = scmp.lt.s32.totalorder (!%p189_p2), %s676_s20, 31  ;;  %v834_v3 = vld [vmem:[%s1169_s1 + $0x18] sm:$0xff] (!%p189_p2)  ;;  %v839_v4 = vld [vmem:[%s1169_s1 + $0x20] sm:$0xff] (!%p189_p2) }
   0x7   : > { %1184 = vst [vmem:[#allocation4_spill] sm:$0xff] (!%p189_p2), %v829_v2  ;;  %1185 = vst [vmem:[#allocation5_spill] sm:$0xff] (!%p189_p2), %v834_v3  ;;  %v844_v5 = vld [vmem:[%s1169_s1 + $0x28] sm:$0xff] (!%p189_p2)  ;;  %v849_v6 = vld [vmem:[%s1169_s1 + $0x30] sm:$0xff] (!%p189_p2) }
   0x8   : > { %1186 = vst [vmem:[#allocation6_spill] sm:$0xff] (!%p189_p2), %v839_v4  ;;  %1187 = vst [vmem:[#allocation7_spill] sm:$0xff] (!%p189_p2), %v844_v5  ;;  %v854_v7 = vld [vmem:[%s1169_s1 + $0x38] sm:$0xff] (!%p189_p2)  ;;  %v859_v8 = vld [vmem:[%s1169_s1 + $0x40] sm:$0xff] (!%p189_p2) }
   0x9   : > { %1188 = vst [vmem:[#allocation8_spill] sm:$0xff] (!%p189_p2), %v849_v6  ;;  %1189 = vst [vmem:[#allocation9_spill] sm:$0xff] (!%p189_p2), %v854_v7  ;;  %v864_v9 = vld [vmem:[%s1169_s1 + $0x48] sm:$0xff] (!%p189_p2)  ;;  %v869_v10 = vld [vmem:[%s1169_s1 + $0x50] sm:$0xff] (!%p189_p2) }
   0xa   : > { %v874_v11 = vld [vmem:[%s1169_s1 + $0x58] sm:$0xff] (!%p189_p2)  ;;  %v879_v12 = vld [vmem:[%s1169_s1 + $0x60] sm:$0xff] (!%p189_p2)  ;;  %v884_v13 = vld [vmem:[%s1169_s1 + $0x68] sm:$0xff] (!%p189_p2) }
   0xb   : > { %v889_v14 = vld [vmem:[%s1169_s1 + $0x70] sm:$0xff] (!%p189_p2)  ;;  %v894_v15 = vld [vmem:[%s1169_s1 + $0x78] sm:$0xff] (!%p189_p2)  ;;  %v899_v16 = vld [vmem:[%s1171_s3] sm:$0xf] (!%p189_p2) }
   0xc   : > { %v904_v17 = vld [vmem:[%s1171_s3 + $0x4] sm:$0xf] (!%p189_p2)  ;;  %v919_v18 = vld [vmem:[%s1171_s3 + $0x8] sm:$0xf] (!%p189_p2)  ;;  %v924_v19 = vld [vmem:[%s1171_s3 + $0xc] sm:$0xf] (!%p189_p2) }
   0xd   : > { %s1199_s20 = smov (!%p217_p3, %s676_s20), 31  ;;  %v929_v20 = vld [vmem:[%s1171_s3 + $0x10] sm:$0xf]  ;;  %v934_v21 = vld [vmem:[%s1171_s3 + $0x14] sm:$0xf] }
   0xe   : > { %s677_s28 = sshll.u32 %s1199_s20, 3  ;;  %v939_v22 = vld [vmem:[%s1171_s3 + $0x18] sm:$0xf]  ;;  %v944_v23 = vld [vmem:[%s1171_s3 + $0x1c] sm:$0xf]  ;;  %s1076_s20 = smov 0  }
   0xf   : > { %s909_s12 = scalar_lea.vmem %s1168_s0, %s677_s28  ;;  %s914_s14 = scalar_lea.vmem %s1173_s5, %s677_s28  ;;  %v949_v24 = vld [vmem:[%s1171_s3 + $0x20] sm:$0xf]  ;;  %v954_v25 = vld [vmem:[%s1171_s3 + $0x24] sm:$0xf]  ;;  %v959_v26 = vld [vmem:[%s1171_s3 + $0x28] sm:$0xf] }
  0x10   : > { %v964_v27 = vld [vmem:[%s1171_s3 + $0x2c] sm:$0xf]  ;;  %v969_v28 = vld [vmem:[%s1171_s3 + $0x30] sm:$0xf]  ;;  %v974_v29 = vld [vmem:[%s1171_s3 + $0x34] sm:$0xf] }
  0x11   : > { %v979_v30 = vld [vmem:[%s1171_s3 + $0x38] sm:$0xf]  ;;  %v984_v31 = vld [vmem:[%s1171_s3 + $0x3c] sm:$0xf]  ;;  %v989_v32 = vld [vmem:[%s1171_s3 + $0x40] sm:$0xf] }
  0x12   : > { %v994_v33 = vld [vmem:[%s1171_s3 + $0x44] sm:$0xf]  ;;  %v999_v34 = vld [vmem:[%s1171_s3 + $0x48] sm:$0xf]  ;;  %v1004_v35 = vld [vmem:[%s1171_s3 + $0x4c] sm:$0xf] }
  0x13   : > { %v1009_v36 = vld [vmem:[%s1171_s3 + $0x50] sm:$0xf]  ;;  %v1014_v37 = vld [vmem:[%s1171_s3 + $0x54] sm:$0xf]  ;;  %v1019_v38 = vld [vmem:[%s1171_s3 + $0x58] sm:$0xf] }
  0x14   : > { %v1024_v39 = vld [vmem:[%s1171_s3 + $0x5c] sm:$0xf]  ;;  %v1029_v40 = vld [vmem:[%s1171_s3 + $0x60] sm:$0xf]  ;;  %v1034_v41 = vld [vmem:[%s1171_s3 + $0x64] sm:$0xf] }
  0x15   : > { %v1039_v42 = vld [vmem:[%s1171_s3 + $0x68] sm:$0xf]  ;;  %v1044_v43 = vld [vmem:[%s1171_s3 + $0x6c] sm:$0xf]  ;;  %v1049_v44 = vld [vmem:[%s1171_s3 + $0x70] sm:$0xf] }
  0x16   : > { %v1054_v45 = vld [vmem:[%s1171_s3 + $0x74] sm:$0xf]  ;;  %v1059_v46 = vld [vmem:[%s1171_s3 + $0x78] sm:$0xf]  ;;  %v1064_v47 = vld [vmem:[%s1171_s3 + $0x7c] sm:$0xf] }
  0x17   : > { %v1069_v48 = vld [vmem:[%s1170_s2] sm:$0x3] }
  0x18   : > { %v1074_v49 = vld [vmem:[%s1172_s4] ss:$0 sm:$0xff] }
  0x19 LB: >> { %v1190_v7 = vld [vmem:[#allocation9_spill] sm:$0xff]  ;;  %v1191_v6 = vld [vmem:[#allocation8_spill] sm:$0xff]  ;;  %v1192_v5 = vld [vmem:[#allocation7_spill] sm:$0xff]  ;;  %v706_v55 = vcombine.low %v989_v32, %v994_v33  ;;  %v698_v56 = vcombine.low %v899_v16, %v904_v17  ;;  %v707_v57 = vcombine.low %v999_v34, %v1004_v35  ;;  %v777_v58 = vmov 0   ;;  %s680_s13 = sshll.u32 %s775_s20, 5  ;;  %s284_s20 = sadd.s32 1, %s775_s20   ;;  %s775_s20 = sphi %s1076_s20, %s284_s20  }
  0x1a   : >> { %v1193_v4 = vld [vmem:[#allocation6_spill] sm:$0xff]  ;;  %v1194_v3 = vld [vmem:[#allocation5_spill] sm:$0xff]  ;;  %v1195_v2 = vld [vmem:[#allocation4_spill] sm:$0xff]  ;;  %416 = vmatprep.mubr.bf16.mxu0 %v777_v58  ;;  %v699_v60 = vcombine.low %v919_v18, %v924_v19  ;;  %v688_v61 = vcombine.high %v1191_v6, %v1190_v7  ;;  %v708_v62 = vcombine.low %v1009_v36, %v1014_v37  ;;  %v687_v63 = vcombine.low %v1191_v6, %v1190_v7  ;;  %s286_s15 = scalar_lea.vmem %s909_s12, %s680_s13  ;;  %s600_s16 = scalar_lea.vmem %s914_s14, %s680_s13 }
  0x1b   : >> { %v1196_v1 = vld [vmem:[#allocation3_spill] sm:$0xff]  ;;  %v1197_v0 = vld [vmem:[#allocation2_spill] sm:$0xff]  ;;  %v684_v52 = vcombine.high %v1195_v2, %v1194_v3  ;;  %v683_v53 = vcombine.low %v1195_v2, %v1194_v3  ;;  %v686_v54 = vcombine.high %v1193_v4, %v1192_v5  ;;  %716 = vmatprep.subr.bf16.mxu1 %v706_v55  ;;  %v685_v59 = vcombine.low %v1193_v4, %v1192_v5  ;;  %p281_p4 = scmp.ge.s32.totalorder %s284_s20, 2  }
  0x1c   : >> { %v682_v50 = vcombine.high %v1197_v0, %v1196_v1  ;;  %v681_v51 = vcombine.low %v1197_v0, %v1196_v1  ;;  %717 = vmatpush3.bf16.msra.mxu1 %v698_v56  ;;  %v692_v55 = vcombine.high %v869_v10, %v874_v11  ;;  %v710_v56 = vcombine.low %v1029_v40, %v1034_v41 }
  0x1d   : >> { %718 = vmatprep.subr.bf16.mxu1 %v707_v57  ;;  %v691_v57 = vcombine.low %v869_v10, %v874_v11  ;;  %vm601_vm0 = vcmask 261120  }
  0x1e   : >> { %384 = vmatprep.subr.bf16.mxu0 %v682_v50  ;;  %v700_v50 = vcombine.low %v929_v20, %v934_v21 }
  0x1f   : >> { %385 = vmatpush1.bf16.msra.mxu0 %v681_v51  ;;  %v690_v51 = vcombine.high %v859_v8, %v864_v9 }
  0x20   : >> { %386 = vmatprep.subr.bf16.mxu0 %v684_v52  ;;  %719 = vmatpush3.bf16.msra.mxu1 %v699_v60  ;;  %v709_v52 = vcombine.low %v1019_v38, %v1024_v39  ;;  %v694_v60 = vcombine.high %v879_v12, %v884_v13 }
  0x21   : >> { %720 = vmatprep.subr.bf16.mxu1 %v708_v62  ;;  %v693_v62 = vcombine.low %v879_v12, %v884_v13 }
  0x23   : >> { %387 = vmatpush1.bf16.msra.mxu0 %v683_v53  ;;  %v689_v53 = vcombine.low %v859_v8, %v864_v9 }
  0x24   : >> { %388 = vmatprep.subr.bf16.mxu0 %v686_v54  ;;  %721 = vmatpush3.bf16.msra.mxu1 %v700_v50  ;;  %v701_v54 = vcombine.low %v939_v22, %v944_v23  ;;  %v695_v50 = vcombine.low %v889_v14, %v894_v15 }
  0x25   : >> { %722 = vmatprep.subr.bf16.mxu1 %v709_v52  ;;  %v288_v52 = vld [vmem:[%s286_s15 + $0x8] sm:$0xff] }
  0x27   : >> { %389 = vmatpush1.bf16.msra.mxu0 %v685_v59  ;;  %v702_v59 = vcombine.low %v949_v24, %v954_v25 }
  0x28   : >> { %390 = vmatprep.subr.bf16.mxu0 %v688_v61  ;;  %723 = vmatpush3.bf16.msra.mxu1 %v701_v54  ;;  %v711_v61 = vcombine.low %v1039_v42, %v1044_v43  ;;  %v289_v54 = vld [vmem:[%s286_s15 + $0x10] sm:$0xff] }
  0x29   : >> { %724 = vmatprep.subr.bf16.mxu1 %v710_v56 }
  0x2b   : >> { %391 = vmatpush1.bf16.msra.mxu0 %v687_v63  ;;  %v696_v63 = vcombine.high %v889_v14, %v894_v15 }
  0x2c   : >> { %392 = vmatprep.subr.bf16.mxu0 %v690_v51  ;;  %725 = vmatpush3.bf16.msra.mxu1 %v702_v59  ;;  %v287_v51 = vld [vmem:[%s286_s15] sm:$0xff]  ;;  %v712_v59 = vcombine.low %v1049_v44, %v1054_v45 }
  0x2d   : >> { %726 = vmatprep.subr.bf16.mxu1 %v711_v61  ;;  %v713_v61 = vcombine.low %v1059_v46, %v1064_v47 }
  0x2f   : >> { %393 = vmatpush1.bf16.msra.mxu0 %v689_v53  ;;  %v291_v53 = vpack.c.bf16 %v288_v52, %v287_v51 }
  0x30   : >> { %394 = vmatprep.subr.bf16.mxu0 %v692_v55  ;;  %v290_v55 = vld [vmem:[%s286_s15 + $0x18] sm:$0xff] }
  0x31   : >> { %v292_v56 = vpack.c.bf16 %v290_v55, %v289_v54 }
  0x33   : >> { %395 = vmatpush1.bf16.msra.mxu0 %v691_v57  ;;  %v703_v57 = vcombine.low %v959_v26, %v964_v27 }
  0x34   : >> { %396 = vmatprep.subr.bf16.mxu0 %v694_v60  ;;  %v704_v60 = vcombine.low %v969_v28, %v974_v29 }
  0x35   : >> { %727 = vmatpush3.bf16.msra.mxu1 %v703_v57 }
  0x36   : >> { %728 = vmatprep.subr.bf16.mxu1 %v712_v59 }
  0x37   : >> { %397 = vmatpush1.bf16.msra.mxu0 %v693_v62  ;;  %v294_v62 = vlaneseq }
  0x38   : >> { %398 = vmatprep.subr.bf16.mxu0 %v696_v63 }
  0x39   : >> { %729 = vmatpush3.bf16.msra.mxu1 %v704_v60  ;;  %v295_v63 = vshrl.u32 %v294_v62, 7 }
  0x3a   : >> { %730 = vmatprep.subr.bf16.mxu1 %v713_v61 }
  0x3b   : >> { %399 = vmatpush1.bf16.msra.mxu0 %v695_v50  ;;  %v296_v50 = vsub.s32 0, %v295_v63  ;;  %v300_v51 = vsub.s32 1, %v295_v63 }
  0x3d   : >> { %v297_v52 = vrot.slane %v1069_v48, %v296_v50 }
  0x3e   : >> { %417 = vmatmul.mubr.bf16.vlgmr.msra.gmra.mrb[0].mxu0 %v291_v53  ;;  %v301_v53 = vrot.slane %v1069_v48, %v300_v51 }
  0x3f   : >> { %426 = vmatprep.mubr.bf16.mxu0 %v777_v58  ;;  %v705_v58 = vcombine.low %v979_v30, %v984_v31 }
  0x41   : >> { %731 = vmatpush3.bf16.msra.mxu1 %v705_v58 }
  0x46   : >> { %427 = vmatmul.mubr.bf16.gmra.mrb[4].mxu0 %v292_v56 }
 0x111   : >> { %v418_v54 = vpop.f32.mrb[0].mxu0 }
 0x112   : >> { %v419_v55 = vadd.f32 %v418_v54, %v297_v52  ;;  %v420_v56 = vpop.f32.mrb[1].mxu0 }
 0x113   : >> { %v421_v57 = vadd.f32 %v420_v56, %v301_v53  ;;  %v422_v59 = vpop.f32.mrb[2].mxu0 }
 0x114   : >> { %v423_v60 = vadd.f32 %v422_v59, %v297_v52  ;;  %v424_v0 = vpop.f32.mrb[3].mxu0  ;;  %v437_v2 = vmax.f32 %v419_v55, 0.0 }
 0x115   : >> { %v425_v1 = vadd.f32 %v424_v0, %v301_v53  ;;  %v438_v61 = vmax.f32 %v421_v57, 0.0 }
 0x116   : >> { %v439_v3 = vmax.f32 %v423_v60, 0.0 }
 0x117   : >> { %v440_v58 = vmax.f32 %v425_v1, 0.0 }
 0x118   : >> { %v445_v4 = vpack.c.bf16 %v439_v3, %v437_v2 }
 0x119   : >> { %v428_v62 = vpop.f32.mrb[4].mxu0  ;;  %v446_v5 = vpack.c.bf16 %v440_v58, %v438_v61 }
 0x11a   : >> { %v429_v63 = vadd.f32 %v428_v62, %v297_v52  ;;  %v430_v6 = vpop.f32.mrb[5].mxu0 }
 0x11b   : >> { %v431_v50 = vadd.f32 %v430_v6, %v301_v53  ;;  %v432_v7 = vpop.f32.mrb[6].mxu0  ;;  %583 = vmatprep.mubr.bf16.mxu1 %v446_v5 }
 0x11c   : >> { %v433_v51 = vadd.f32 %v432_v7, %v297_v52  ;;  %v434_v54 = vpop.f32.mrb[7].mxu0  ;;  %584 = vmatmul.mubr.bf16.vlgmr.msra.gmra.mrb[0].mxu1 %v445_v4  ;;  %v441_v59 = vmax.f32 %v429_v63, 0.0 }
 0x11d   : >> { %v435_v56 = vadd.f32 %v434_v54, %v301_v53  ;;  %v442_v55 = vmax.f32 %v431_v50, 0.0 }
 0x11e   : >> { %v443_v0 = vmax.f32 %v433_v51, 0.0 }
 0x11f   : >> { %v444_v60 = vmax.f32 %v435_v56, 0.0 }
 0x120   : >> { %v447_v57 = vpack.c.bf16 %v443_v0, %v441_v59 }
 0x121   : >> { %v448_v1 = vpack.c.bf16 %v444_v60, %v442_v55 }
 0x123   : >> { %591 = vmatprep.mubr.bf16.mxu1 %v448_v1 }
 0x124   : >> { %592 = vmatmul.mubr.bf16.gmra.mrb[4].mxu1 %v447_v57 }
 0x1ef   : >> { %v732_v2 = vpop.f32.mrb[0].mxu1 }
 0x1f0   : >> { %v733_v3 = vpop.f32.mrb[1].mxu1 }
 0x1f1   : >> { %v734_v61 = vadd.f32 %v733_v3, %v732_v2  ;;  %v735_v6 = vpop.f32.mrb[2].mxu1 }
 0x1f2   : >> { %v736_v5 = vpop.f32.mrb[3].mxu1 }
 0x1f3   : >> { %v586_v7 = vadd.f32 %v734_v61, %v1074_v49  ;;  %v737_v4 = vadd.f32 %v736_v5, %v735_v6 }
 0x1f5   : >> { %602 = vst.msk [vmem:[%s600_s16] sm:$0xff] %vm601_vm0, %v586_v7  ;;  %v589_v52 = vadd.f32 %v737_v4, %v1074_v49 }
 0x1f7   : >> { %603 = vst.msk [vmem:[%s600_s16 + $0x8] sm:$0xff] %vm601_vm0, %v589_v52  ;;  %v738_v53 = vpop.f32.mrb[4].mxu1 }
 0x1f8   : >> { %v739_v58 = vpop.f32.mrb[5].mxu1 }
 0x1f9   : >> { %v740_v62 = vadd.f32 %v739_v58, %v738_v53  ;;  %v741_v63 = vpop.f32.mrb[6].mxu1  ;;  %283 = sbr.rel (!%p281_p4) target bundleno = 25 (0x19), region = 79 }
 0x1fa   : >> { %v742_v50 = vpop.f32.mrb[7].mxu1 }
 0x1fb   : >> { %v594_v51 = vadd.f32 %v740_v62, %v1074_v49  ;;  %v743_v54 = vadd.f32 %v742_v50, %v741_v63 }
 0x1fd   : >> { %604 = vst.msk [vmem:[%s600_s16 + $0x10] sm:$0xff] %vm601_vm0, %v594_v51  ;;  %v597_v56 = vadd.f32 %v743_v54, %v1074_v49 }
 0x1ff   : >> { %605 = vst.msk [vmem:[%s600_s16 + $0x18] sm:$0xff] %vm601_vm0, %v597_v56 }
 0x200 PF: > { %s15_s18 = sadd.s32 1, %s771_s18  }
 0x201   : > { %p12_p5 = scmp.ge.s32.totalorder %s15_s18, 6  }
 0x203   :  { %14 = sbr.rel (!%p12_p5) target bundleno = 1 (0x1), region = 90 }

</bundles_post_ra>
